<compile_context>
chip_gen: v5e
topology: v5e:2x2
jax: 0.10.0
libtpu: 0.0.40
codegen_flags: <defaults>
</compile_context>

<pallas_src>
import jax
import jax.numpy as jnp
from jax.experimental import pallas as pl
from jax.experimental.pallas import tpu as pltpu

_LANE = 128
_MAX_BLOCK_BYTES = 4 << 20   # 4 MiB per block; double-buffered in+out ~= 16 MiB
_MIN_SPLIT_BYTES = 1 << 20   # above this, force >= 2 grid steps (v7x 2-TC sharding)


def _elementwise_kernel(x_ref, o_ref):
    # ((x + 2) * 3 - 5) / 2  ==  1.5 * x + 0.5
    # (exact in real arithmetic; differs from the unfolded sequence only by
    #  last-bit fp rounding, well within tolerance)
    o_ref[...] = x_ref[...] * 1.5 + 0.5


def _round_up(a, b):
    return pl.cdiv(a, b) * b


def pt_module_forward(x):
    """y = ((x + 2) * 3 - 5) / 2, elementwise."""
    orig_shape = x.shape

    # PyTorch's `/ 2` promotes integer tensors to float; mirror that.
    if not jnp.issubdtype(x.dtype, jnp.floating):
        x = x.astype(jnp.float32)
    out_dtype = x.dtype
    itemsize = jnp.dtype(out_dtype).itemsize
    n = x.size

    # dtype-aware sublane granule: 8 rows (32-bit), 16 (16-bit), 32 (8-bit)
    # keeps (sublane, lane) tiles fully packed -> unmasked vst, dense DMA.
    granule = 8 * (4 // itemsize)

    # Lane-dense 2D slab; pad only to the granule (tiny), never to a block.
    rows = _round_up(pl.cdiv(n, _LANE), granule)
    padded = rows * _LANE

    x_flat = jnp.ravel(x)
    if padded != n:
        x_flat = jnp.pad(x_flat, (0, padded - n))
    x2d = x_flat.reshape(rows, _LANE)

    row_bytes = _LANE * itemsize
    slab_bytes = rows * row_bytes

    cost = pl.CostEstimate(
        flops=2 * n, transcendentals=0, bytes_accessed=2 * n * itemsize
    )

    if slab_bytes <= _MIN_SPLIT_BYTES:
        # Overhead-dominated small case: gridless, whole slab resident in VMEM.
        out2d = pl.pallas_call(
            _elementwise_kernel,
            out_shape=jax.ShapeDtypeStruct((rows, _LANE), out_dtype),
            cost_estimate=cost,
        )(x2d)
    else:
        # Streaming path: large balanced blocks (<= ~4 MiB), at least 2 of them
        # so the parallel grid axis can shard across v7x's two TensorCores.
        max_block_rows = max(
            granule, (_MAX_BLOCK_BYTES // row_bytes) // granule * granule
        )
        num_blocks = max(2, pl.cdiv(rows, max_block_rows))
        block_rows = min(
            _round_up(pl.cdiv(rows, num_blocks), granule), max_block_rows
        )
        grid = (pl.cdiv(rows, block_rows),)

        out2d = pl.pallas_call(
            _elementwise_kernel,
            out_shape=jax.ShapeDtypeStruct((rows, _LANE), out_dtype),
            grid=grid,
            in_specs=[pl.BlockSpec((block_rows, _LANE), lambda i: (i, 0))],
            out_specs=pl.BlockSpec((block_rows, _LANE), lambda i: (i, 0)),
            compiler_params=pltpu.CompilerParams(
                dimension_semantics=("parallel",),
            ),
            cost_estimate=cost,
        )(x2d)

    if padded != n:
        return out2d.reshape(-1)[:n].reshape(orig_shape)
    return out2d.reshape(orig_shape)


if __name__ == "__main__":
    key = jax.random.PRNGKey(0)

    # Small input (gridless path), matching the module's elementwise spec.
    x_small = jax.random.normal(key, (2, 4, 16, 16), dtype=jnp.float32)
    y_small = pt_module_forward(x_small)
    jax.block_until_ready(y_small)
    y_small_ref = ((x_small + 2.0) * 3.0 - 5.0) / 2.0
    assert y_small.shape == x_small.shape and y_small.dtype == x_small.dtype
    assert jnp.allclose(y_small, y_small_ref, atol=1e-5, rtol=1e-6)

    # Medium input to exercise the tiled / parallel-grid path as well.
    x_med = jax.random.normal(key, (8, 4, 128, 128), dtype=jnp.float32)
    y_med = pt_module_forward(x_med)
    jax.block_until_ready(y_med)
    y_med_ref = ((x_med + 2.0) * 3.0 - 5.0) / 2.0
    assert y_med.shape == x_med.shape and y_med.dtype == x_med.dtype
    assert jnp.allclose(y_med, y_med_ref, atol=1e-5, rtol=1e-6)

    print("KERNEL_OK")
</pallas_src>

<mosaic_0001>
module attributes {stable_mosaic.version = 11 : i64} {
  func.func @_elementwise_kernel(%arg0: memref<16x128xf32, #tpu.memory_space<vmem>>, %arg1: memref<16x128xf32, #tpu.memory_space<vmem>>) attributes {dimension_semantics = [], scalar_prefetch = 0 : i64, scratch_operands = 0 : i64, tpu.core_type = #tpu.core_type<tc>} {
    %c0 = arith.constant 0 : index
    %c0_0 = arith.constant 0 : index
    %0 = vector.load %arg0[%c0, %c0_0] : memref<16x128xf32, #tpu.memory_space<vmem>>, vector<16x128xf32>
    %cst = arith.constant 1.500000e+00 : f32
    %1 = vector.broadcast %cst : f32 to vector<16x128xf32>
    %2 = arith.mulf %0, %1 : vector<16x128xf32>
    %cst_1 = arith.constant 5.000000e-01 : f32
    %3 = vector.broadcast %cst_1 : f32 to vector<16x128xf32>
    %4 = arith.addf %2, %3 : vector<16x128xf32>
    %c0_2 = arith.constant 0 : index
    %c0_3 = arith.constant 0 : index
    %5 = vector.load %arg1[%c0_2, %c0_3] : memref<16x128xf32, #tpu.memory_space<vmem>>, vector<16x128xf32>
    tpu.vector_store %arg1[%c0_2, %c0_3], %4 {strides = array<i32>} : memref<16x128xf32, #tpu.memory_space<vmem>>, vector<16x128xf32>,
    return
  }
}

</mosaic_0001>

<bundles_post_ra>
// kernel: tpu_custom_call.1
= control target key start
LH: loop header
LB: loop body
LE: loop exit
PB: predicated region body
PF: predicated region fallthrough
CT: control target
= control target key end

     0   :  { %6 = vsyncpa [#allocation3], 0  ;;  %s128_s0 = inlined_call_operand.hbm [shape: f32[16,128], index: 0, kind: input, shape index: {}]   ;;  %s129_s1 = inlined_call_operand.hbm [shape: f32[16,128], index: 1, kind: output, shape index: {}]  }
   0x1   :  { %7 = vsyncpa [#allocation4], 0  ;;  %s12_s8 = sshll.u32 %s128_s0, 4  ;;  %s108_s9 = smov [#allocation2]   ;;  %s13_s8 = int_to_ptr.hbm [resolvable:$true] %s12_s8 }
   0x2   :  { %s14_s10 = sshll.u32 %s108_s9, 4  ;;  %s109_s11 = smov 128   ;;  %s15_s10 = int_to_ptr.vmem [resolvable:$true] %s14_s10 }
   0x3   :  { %s110_s12 = smov 8  }
   0x4   :  { %20 = dma.hbm_to_vmem [thread:$0]  %s13_s8, 256, %s15_s10, [#allocation3], %s109_s11, %s109_s11, %s110_s12  }
   0x5   :  { %104 = dma.done.wait [#allocation3], 256  }
   0x6   :  { %105 = vsyncadd [#allocation3], 4294967040  ;;  %v25_v0 = vld [vmem:[#allocation2] sm:$0xff]  ;;  %v26_v1 = vld [vmem:[#allocation2 + $0x8] sm:$0xff]  ;;  %s111_s13 = smov [#allocation5]   ;;  %s39_s17 = sshll.u32 %s129_s1, 4  ;;  %s40_s17 = int_to_ptr.hbm [resolvable:$true] %s39_s17 }
   0x7   :  { %v27_v2 = vmul.f32 1.5, %v25_v0  ;;  %v28_v3 = vmul.f32 1.5, %v26_v1  ;;  %s37_s14 = sshll.u32 %s111_s13, 4  ;;  %s38_s14 = int_to_ptr.vmem [resolvable:$true] %s37_s14 }
   0x9   :  { %v29_v4 = vadd.f32 0.5, %v27_v2  ;;  %v30_v5 = vadd.f32 0.5, %v28_v3 }
   0xb   :  { %31 = vst [vmem:[#allocation5] sm:$0xff] %v29_v4 }
   0xc   :  { %32 = vst [vmem:[#allocation5 + $0x8] sm:$0xff] %v30_v5 }
   0xd   :  { %45 = dma.vmem_to_hbm [thread:$0]  %s38_s14, 256, %s40_s17, [#allocation4], %s109_s11, %s109_s11, %s110_s12  }
   0xe   :  { %106 = dma.done.wait [#allocation4], 256  }
   0xf   :  { %107 = vsyncadd [#allocation4], 4294967040 }
  0x10   :  { %50 = vsyncpa [#allocation3], 1 }
  0x11   :  { %51 = vsyncpa [#allocation4], 1 }

</bundles_post_ra>
